<compile_context>
chip_gen: v6e
topology: v6e:2x2x1
jax: 0.10.0
libtpu: 0.0.40
codegen_flags: <defaults>
</compile_context>

<pallas_src>
import jax
import jax.numpy as jnp
from jax import lax
from jax.experimental import pallas as pl
from jax.experimental.pallas import tpu as pltpu

BN_EPS = 1e-5
NEG_INF = float("-inf")
GROUP = 8  # source rows processed per inner step (one sublane group)


def _round_up(x, m):
    return (x + m - 1) // m * m


def _agg_kernel(h_ref, adj_ref, agg_ref, stats_ref, acc_ref, grp_ref):
    """Max-aggregation over streamed source tiles.

    h_ref    : (TS, Cp)         f32   source-node features (current src tile)
    adj_ref  : (TM, TS)         int8  adj[dst, src] tile
    agg_ref  : (TM, Cp)         f32   aggregated output       (written at finalize)
    stats_ref: (8,  Cp)         f32   row0 = sum, row1 = sum of squares (finalize)
    acc_ref  : (TM, Cp)         f32   running-max scratch
    grp_ref  : (TS//8, TM, 8)   f32   per-group additive mask (0 / -inf) scratch
    """
    s = pl.program_id(1)
    n_s = pl.num_programs(1)
    tm, ts = adj_ref.shape
    cp = h_ref.shape[1]
    n_groups = ts // GROUP

    @pl.when(s == 0)
    def _init():
        acc_ref[...] = jnp.full(acc_ref.shape, NEG_INF, acc_ref.dtype)

    # Stage the int8 adjacency tile as grouped f32 additive masks (0 where an edge
    # exists, -inf otherwise) so the hot loop below only indexes the group (major)
    # axis -- all lane slicing stays static.  One compare over the whole tile.
    mask_full = jnp.where(adj_ref[...].astype(jnp.float32) > 0.0, 0.0, NEG_INF)
    for g in range(n_groups):                                    # static, <= TS/8
        grp_ref[g] = mask_full[:, g * GROUP:(g + 1) * GROUP]     # (TM, 8)

    def group_body(g, carry):
        h8 = h_ref[pl.ds(g * GROUP, GROUP), :]                   # (8, Cp)
        m8 = grp_ref[g]                                          # (TM, 8)
        acc = acc_ref[...]
        for jj in range(GROUP):                                  # 8 x 2-D VPU ops
            # (1, Cp) sublane-broadcast + (TM, 1) lane-broadcast -> masked max.
            acc = jnp.maximum(acc, h8[jj:jj + 1, :] + m8[:, jj:jj + 1])
        acc_ref[...] = acc
        return carry

    lax.fori_loop(0, n_groups, group_body, 0, unroll=True)

    @pl.when(s == n_s - 1)
    def _finalize():
        acc = acc_ref[...]
        # Nodes with no incoming edges -> 0 (PyG scatter 'max' fill behaviour).
        agg = jnp.where(acc > NEG_INF, acc, 0.0)
        agg_ref[...] = agg
        ssum = jnp.sum(agg, axis=0, keepdims=True)               # (1, Cp)
        ssq = jnp.sum(agg * agg, axis=0, keepdims=True)          # (1, Cp)
        rows = lax.broadcasted_iota(jnp.int32, (8, cp), 0)
        stats_ref[...] = jnp.where(rows == 0, ssum,
                                   jnp.where(rows == 1, ssq, 0.0))


def _bn_relu_kernel(agg_ref, scale_ref, shift_ref, y_ref):
    """Fused BatchNorm affine (precomputed scale/shift) + ReLU."""
    y_ref[...] = jnp.maximum(agg_ref[...] * scale_ref[...] + shift_ref[...], 0.0)


@jax.jit
def gcn_bn_forward(x, edge_index, w, b, gamma, beta):
    n, cin = x.shape
    cout = w.shape[0]
    f32 = jnp.float32

    # ---- tiling: lane-dense channels, dst/src row tiles ----
    cp = _round_up(cout, 128)
    if n <= 256:
        n_pad = _round_up(max(n, GROUP), GROUP)
        tm = ts = n_pad                       # single block per axis
    else:
        tm, ts = 256, 256
        n_pad = _round_up(n, 256)
    n_d = n_pad // tm
    n_s = n_pad // ts

    x32 = x.astype(f32)

    # ---- pad parameters to Cp channels (gamma=1 / beta=0 on padded lanes) ----
    wp = jnp.zeros((cp, cin), f32).at[:cout].set(w.astype(f32))
    bp = jnp.zeros((cp,), f32).at[:cout].set(b.astype(f32))
    gp = jnp.ones((cp,), f32).at[:cout].set(gamma.astype(f32))
    bep = jnp.zeros((cp,), f32).at[:cout].set(beta.astype(f32))

    # ---- Linear hoisted to XLA (Cin tiny -> in-kernel MXU would be <1% used) ----
    x_pad = jnp.zeros((n_pad, cin), f32).at[:n].set(x32)
    h = x_pad @ wp.T + bp                                        # (n_pad, cp)

    # ---- int8 dense adjacency, adj[dst, src] (messages flow src -> dst) ----
    src, dst = edge_index[0], edge_index[1]
    adj = jnp.zeros((n_pad, n_pad), jnp.int8).at[dst, src].set(1)

    # ---- kernel 1: tiled, pipelined max-aggregation + partial BN stats ----
    agg, stats = pl.pallas_call(
        _agg_kernel,
        out_shape=(jax.ShapeDtypeStruct((n_pad, cp), f32),
                   jax.ShapeDtypeStruct((n_d * 8, cp), f32)),
        grid_spec=pltpu.PrefetchScalarGridSpec(
            num_scalar_prefetch=0,
            grid=(n_d, n_s),
            in_specs=[
                pl.BlockSpec((ts, cp), lambda d, s: (s, 0)),     # h (source tile)
                pl.BlockSpec((tm, ts), lambda d, s: (d, s)),     # adjacency tile
            ],
            out_specs=[
                pl.BlockSpec((tm, cp), lambda d, s: (d, 0)),     # agg
                pl.BlockSpec((8, cp), lambda d, s: (d, 0)),      # per-tile stats
            ],
            scratch_shapes=[
                pltpu.VMEM((tm, cp), f32),                       # running max
                pltpu.VMEM((ts // GROUP, tm, GROUP), f32),       # grouped masks
            ],
        ),
        compiler_params=pltpu.CompilerParams(
            dimension_semantics=("parallel", "arbitrary"),
            vmem_limit_bytes=32 * 1024 * 1024),
    )(h, adj)

    # ---- global BatchNorm statistics (cross-tile reduction is tiny -> JAX glue) ----
    stats = stats.reshape(n_d, 8, cp)
    ssum = jnp.sum(stats[:, 0, :], axis=0)
    ssq = jnp.sum(stats[:, 1, :], axis=0)
    mean = ssum / n
    var = jnp.maximum(ssq / n - mean * mean, 0.0)   # biased (train-mode) variance
    scale = gp * lax.rsqrt(var + BN_EPS)
    shift = bep - mean * scale

    # ---- kernel 2: lane-dense affine + ReLU, row-parallel ----
    y = pl.pallas_call(
        _bn_relu_kernel,
        out_shape=jax.ShapeDtypeStruct((n_pad, cp), f32),
        grid_spec=pltpu.PrefetchScalarGridSpec(
            num_scalar_prefetch=0,
            grid=(n_d,),
            in_specs=[
                pl.BlockSpec((tm, cp), lambda d: (d, 0)),
                pl.BlockSpec((1, cp), lambda d: (0, 0)),
                pl.BlockSpec((1, cp), lambda d: (0, 0)),
            ],
            out_specs=pl.BlockSpec((tm, cp), lambda d: (d, 0)),
        ),
        compiler_params=pltpu.CompilerParams(
            dimension_semantics=("parallel",)),
    )(agg, scale.reshape(1, cp), shift.reshape(1, cp))

    # ---- final concat with original features (ragged Cin+Cout lanes -> JAX glue) ----
    return jnp.concatenate([x32, y[:n, :cout]], axis=-1)


def _reference(x, edge_index, w, b, gamma, beta):
    """Pure-JAX reference of the same forward pass (sanity check)."""
    n = x.shape[0]
    h = x @ w.T + b
    src, dst = edge_index[0], edge_index[1]
    adj = jnp.zeros((n, n), jnp.float32).at[dst, src].set(1.0)
    msgs = jnp.where(adj[:, :, None] > 0.0, h[None, :, :], -jnp.inf)
    agg = jnp.max(msgs, axis=1)
    agg = jnp.where(jnp.sum(adj, axis=1, keepdims=True) > 0.0, agg, 0.0)
    mean = jnp.mean(agg, axis=0, keepdims=True)
    var = jnp.mean((agg - mean) ** 2, axis=0, keepdims=True)
    y = (agg - mean) / jnp.sqrt(var + BN_EPS) * gamma + beta
    y = jnp.maximum(y, 0.0)
    return jnp.concatenate([x, y], axis=-1)


if __name__ == "__main__":
    N, CIN, COUT = 13, 4, 32   # 13 = 12-node bidirectional ring + 1 isolated node

    key = jax.random.PRNGKey(0)
    kx, kw, kb, kg, kbe = jax.random.split(key, 5)

    x = jax.random.normal(kx, (N, CIN), dtype=jnp.float32)

    ring = jnp.arange(12)
    src = jnp.concatenate([ring, (ring + 1) % 12])
    dst = jnp.concatenate([(ring + 1) % 12, ring])
    edge_index = jnp.stack([src, dst]).astype(jnp.int32)        # (2, 24)

    w = jax.random.normal(kw, (COUT, CIN), dtype=jnp.float32) * (1.0 / jnp.sqrt(CIN))
    b = jax.random.normal(kb, (COUT,), dtype=jnp.float32) * 0.1
    gamma = 1.0 + 0.1 * jax.random.normal(kg, (COUT,), dtype=jnp.float32)
    beta = 0.05 * jax.random.normal(kbe, (COUT,), dtype=jnp.float32)

    out = gcn_bn_forward(x, edge_index, w, b, gamma, beta)
    out = jax.block_until_ready(out)

    ref = _reference(x, edge_index, w, b, gamma, beta)
    assert out.shape == (N, CIN + COUT), out.shape
    assert jnp.allclose(out, ref, atol=1e-4, rtol=1e-4), "mismatch vs reference"

    # TODO(synk): BatchNorm1d running_mean/running_var buffer updates (training-time
    # side effects) are not carried; train-mode batch statistics are used.
    print("KERNEL_OK")
</pallas_src>

<mosaic_0001>
module attributes {stable_mosaic.version = 11 : i64} {
  func.func @_agg_kernel(%arg0: i32, %arg1: i32, %arg2: memref<16x128xf32, #tpu.memory_space<vmem>>, %arg3: memref<16x16xi8, #tpu.memory_space<vmem>>, %arg4: memref<16x128xf32, #tpu.memory_space<vmem>>, %arg5: memref<8x128xf32, #tpu.memory_space<vmem>>, %arg6: memref<16x128xf32, #tpu.memory_space<vmem>>, %arg7: memref<2x16x8xf32, #tpu.memory_space<vmem>>) attributes {dimension_semantics = [#tpu.dimension_semantics<parallel>, #tpu.dimension_semantics<arbitrary>], iteration_bounds = array<i64: 1, 1>, scalar_prefetch = 0 : i64, scratch_operands = 2 : i64, tpu.core_type = #tpu.core_type<tc>, window_params = [{transform_indices = @transform_0, window_bounds = array<i64: 16, 128>}, {transform_indices = @transform_1, window_bounds = array<i64: 16, 16>}, {transform_indices = @transform_2, window_bounds = array<i64: 16, 128>}, {transform_indices = @transform_3, window_bounds = array<i64: 8, 128>}]} {
    %c0_i32 = arith.constant 0 : i32
    %0 = arith.cmpi eq, %arg1, %c0_i32 : i32
    %1 = arith.extui %0 : i1 to i32
    %c0_i32_0 = arith.constant 0 : i32
    %2 = arith.cmpi ne, %1, %c0_i32_0 : i32
    scf.if %2 {
      %cst_27 = arith.constant 0xFF800000 : f32
      %133 = vector.broadcast %cst_27 : f32 to vector<16x128xf32>
      %c0_28 = arith.constant 0 : index
      %c0_29 = arith.constant 0 : index
      %134 = vector.load %arg6[%c0_28, %c0_29] : memref<16x128xf32, #tpu.memory_space<vmem>>, vector<16x128xf32>
      tpu.vector_store %arg6[%c0_28, %c0_29], %133 {strides = array<i32>} : memref<16x128xf32, #tpu.memory_space<vmem>>, vector<16x128xf32>,
    } else {
    }
    %c0 = arith.constant 0 : index
    %c0_1 = arith.constant 0 : index
    %3 = vector.load %arg3[%c0, %c0_1] : memref<16x16xi8, #tpu.memory_space<vmem>>, vector<16x16xi8>
    %4 = arith.sitofp %3 : vector<16x16xi8> to vector<16x16xf32>
    %cst = arith.constant 0.000000e+00 : f32
    %5 = vector.broadcast %cst : f32 to vector<16x16xf32>
    %6 = arith.cmpf ogt, %4, %5 : vector<16x16xf32>
    %cst_2 = arith.constant 0.000000e+00 : f32
    %cst_3 = arith.constant 0xFF800000 : f32
    %7 = vector.broadcast %cst_2 : f32 to vector<16x16xf32>
    %8 = vector.broadcast %cst_3 : f32 to vector<16x16xf32>
    %9 = arith.select %6, %7, %8 : vector<16x16xi1>, vector<16x16xf32>
    %10 = vector.extract_strided_slice %9 {offsets = [0, 0], sizes = [16, 8], strides = [1, 1]} : vector<16x16xf32> to vector<16x8xf32>
    %c0_4 = arith.constant 0 : index
    %c0_5 = arith.constant 0 : index
    %c0_6 = arith.constant 0 : index
    %11 = vector.load %arg7[%c0_4, %c0_5, %c0_6] : memref<2x16x8xf32, #tpu.memory_space<vmem>>, vector<1x16x8xf32>
    %12 = vector.shape_cast %11 : vector<1x16x8xf32> to vector<16x8xf32>
    %13 = vector.shape_cast %10 : vector<16x8xf32> to vector<1x16x8xf32>
    tpu.vector_store %arg7[%c0_4, %c0_5, %c0_6], %13 {strides = array<i32>} : memref<2x16x8xf32, #tpu.memory_space<vmem>>, vector<1x16x8xf32>,
    %14 = vector.extract_strided_slice %9 {offsets = [0, 8], sizes = [16, 8], strides = [1, 1]} : vector<16x16xf32> to vector<16x8xf32>
    %c1 = arith.constant 1 : index
    %c0_7 = arith.constant 0 : index
    %c0_8 = arith.constant 0 : index
    %15 = vector.load %arg7[%c1, %c0_7, %c0_8] : memref<2x16x8xf32, #tpu.memory_space<vmem>>, vector<1x16x8xf32>
    %16 = vector.shape_cast %15 : vector<1x16x8xf32> to vector<16x8xf32>
    %17 = vector.shape_cast %14 : vector<16x8xf32> to vector<1x16x8xf32>
    tpu.vector_store %arg7[%c1, %c0_7, %c0_8], %17 {strides = array<i32>} : memref<2x16x8xf32, #tpu.memory_space<vmem>>, vector<1x16x8xf32>,
    %c0_i32_9 = arith.constant 0 : i32
    %c8_i32 = arith.constant 8 : i32
    %18 = arith.muli %c0_i32_9, %c8_i32 : i32
    %19 = arith.index_cast %18 : i32 to index
    %c0_10 = arith.constant 0 : index
    %20 = vector.load %arg2[%19, %c0_10] : memref<16x128xf32, #tpu.memory_space<vmem>>, vector<8x128xf32>
    %21 = arith.index_cast %c0_i32_9 : i32 to index
    %c0_11 = arith.constant 0 : index
    %c0_12 = arith.constant 0 : index
    %22 = vector.load %arg7[%21, %c0_11, %c0_12] : memref<2x16x8xf32, #tpu.memory_space<vmem>>, vector<1x16x8xf32>
    %23 = vector.shape_cast %22 : vector<1x16x8xf32> to vector<16x8xf32>
    %c0_13 = arith.constant 0 : index
    %c0_14 = arith.constant 0 : index
    %24 = vector.load %arg6[%c0_13, %c0_14] : memref<16x128xf32, #tpu.memory_space<vmem>>, vector<16x128xf32>
    %25 = vector.extract_strided_slice %20 {offsets = [0, 0], sizes = [1, 128], strides = [1, 1]} : vector<8x128xf32> to vector<1x128xf32>
    %26 = vector.extract_strided_slice %23 {offsets = [0, 0], sizes = [16, 1], strides = [1, 1]} : vector<16x8xf32> to vector<16x1xf32>
    %27 = vector.broadcast %25 : vector<1x128xf32> to vector<16x128xf32>
    %28 = vector.broadcast %26 : vector<16x1xf32> to vector<16x128xf32>
    %29 = arith.addf %27, %28 : vector<16x128xf32>
    %30 = arith.maximumf %24, %29 : vector<16x128xf32>
    %31 = vector.extract_strided_slice %20 {offsets = [1, 0], sizes = [1, 128], strides = [1, 1]} : vector<8x128xf32> to vector<1x128xf32>
    %32 = vector.extract_strided_slice %23 {offsets = [0, 1], sizes = [16, 1], strides = [1, 1]} : vector<16x8xf32> to vector<16x1xf32>
    %33 = vector.broadcast %31 : vector<1x128xf32> to vector<16x128xf32>
    %34 = vector.broadcast %32 : vector<16x1xf32> to vector<16x128xf32>
    %35 = arith.addf %33, %34 : vector<16x128xf32>
    %36 = arith.maximumf %30, %35 : vector<16x128xf32>
    %37 = vector.extract_strided_slice %20 {offsets = [2, 0], sizes = [1, 128], strides = [1, 1]} : vector<8x128xf32> to vector<1x128xf32>
    %38 = vector.extract_strided_slice %23 {offsets = [0, 2], sizes = [16, 1], strides = [1, 1]} : vector<16x8xf32> to vector<16x1xf32>
    %39 = vector.broadcast %37 : vector<1x128xf32> to vector<16x128xf32>
    %40 = vector.broadcast %38 : vector<16x1xf32> to vector<16x128xf32>
    %41 = arith.addf %39, %40 : vector<16x128xf32>
    %42 = arith.maximumf %36, %41 : vector<16x128xf32>
    %43 = vector.extract_strided_slice %20 {offsets = [3, 0], sizes = [1, 128], strides = [1, 1]} : vector<8x128xf32> to vector<1x128xf32>
    %44 = vector.extract_strided_slice %23 {offsets = [0, 3], sizes = [16, 1], strides = [1, 1]} : vector<16x8xf32> to vector<16x1xf32>
    %45 = vector.broadcast %43 : vector<1x128xf32> to vector<16x128xf32>
    %46 = vector.broadcast %44 : vector<16x1xf32> to vector<16x128xf32>
    %47 = arith.addf %45, %46 : vector<16x128xf32>
    %48 = arith.maximumf %42, %47 : vector<16x128xf32>
    %49 = vector.extract_strided_slice %20 {offsets = [4, 0], sizes = [1, 128], strides = [1, 1]} : vector<8x128xf32> to vector<1x128xf32>
    %50 = vector.extract_strided_slice %23 {offsets = [0, 4], sizes = [16, 1], strides = [1, 1]} : vector<16x8xf32> to vector<16x1xf32>
    %51 = vector.broadcast %49 : vector<1x128xf32> to vector<16x128xf32>
    %52 = vector.broadcast %50 : vector<16x1xf32> to vector<16x128xf32>
    %53 = arith.addf %51, %52 : vector<16x128xf32>
    %54 = arith.maximumf %48, %53 : vector<16x128xf32>
    %55 = vector.extract_strided_slice %20 {offsets = [5, 0], sizes = [1, 128], strides = [1, 1]} : vector<8x128xf32> to vector<1x128xf32>
    %56 = vector.extract_strided_slice %23 {offsets = [0, 5], sizes = [16, 1], strides = [1, 1]} : vector<16x8xf32> to vector<16x1xf32>
    %57 = vector.broadcast %55 : vector<1x128xf32> to vector<16x128xf32>
    %58 = vector.broadcast %56 : vector<16x1xf32> to vector<16x128xf32>
    %59 = arith.addf %57, %58 : vector<16x128xf32>
    %60 = arith.maximumf %54, %59 : vector<16x128xf32>
    %61 = vector.extract_strided_slice %20 {offsets = [6, 0], sizes = [1, 128], strides = [1, 1]} : vector<8x128xf32> to vector<1x128xf32>
    %62 = vector.extract_strided_slice %23 {offsets = [0, 6], sizes = [16, 1], strides = [1, 1]} : vector<16x8xf32> to vector<16x1xf32>
    %63 = vector.broadcast %61 : vector<1x128xf32> to vector<16x128xf32>
    %64 = vector.broadcast %62 : vector<16x1xf32> to vector<16x128xf32>
    %65 = arith.addf %63, %64 : vector<16x128xf32>
    %66 = arith.maximumf %60, %65 : vector<16x128xf32>
    %67 = vector.extract_strided_slice %20 {offsets = [7, 0], sizes = [1, 128], strides = [1, 1]} : vector<8x128xf32> to vector<1x128xf32>
    %68 = vector.extract_strided_slice %23 {offsets = [0, 7], sizes = [16, 1], strides = [1, 1]} : vector<16x8xf32> to vector<16x1xf32>
    %69 = vector.broadcast %67 : vector<1x128xf32> to vector<16x128xf32>
    %70 = vector.broadcast %68 : vector<16x1xf32> to vector<16x128xf32>
    %71 = arith.addf %69, %70 : vector<16x128xf32>
    %72 = arith.maximumf %66, %71 : vector<16x128xf32>
    %c0_15 = arith.constant 0 : index
    %c0_16 = arith.constant 0 : index
    %73 = vector.load %arg6[%c0_15, %c0_16] : memref<16x128xf32, #tpu.memory_space<vmem>>, vector<16x128xf32>
    tpu.vector_store %arg6[%c0_15, %c0_16], %72 {strides = array<i32>} : memref<16x128xf32, #tpu.memory_space<vmem>>, vector<16x128xf32>,
    %c1_i32 = arith.constant 1 : i32
    %c8_i32_17 = arith.constant 8 : i32
    %74 = arith.muli %c1_i32, %c8_i32_17 : i32
    %75 = arith.index_cast %74 : i32 to index
    %c0_18 = arith.constant 0 : index
    %76 = vector.load %arg2[%75, %c0_18] : memref<16x128xf32, #tpu.memory_space<vmem>>, vector<8x128xf32>
    %77 = arith.index_cast %c1_i32 : i32 to index
    %c0_19 = arith.constant 0 : index
    %c0_20 = arith.constant 0 : index
    %78 = vector.load %arg7[%77, %c0_19, %c0_20] : memref<2x16x8xf32, #tpu.memory_space<vmem>>, vector<1x16x8xf32>
    %79 = vector.shape_cast %78 : vector<1x16x8xf32> to vector<16x8xf32>
    %c0_21 = arith.constant 0 : index
    %c0_22 = arith.constant 0 : index
    %80 = vector.load %arg6[%c0_21, %c0_22] : memref<16x128xf32, #tpu.memory_space<vmem>>, vector<16x128xf32>
    %81 = vector.extract_strided_slice %76 {offsets = [0, 0], sizes = [1, 128], strides = [1, 1]} : vector<8x128xf32> to vector<1x128xf32>
    %82 = vector.extract_strided_slice %79 {offsets = [0, 0], sizes = [16, 1], strides = [1, 1]} : vector<16x8xf32> to vector<16x1xf32>
    %83 = vector.broadcast %81 : vector<1x128xf32> to vector<16x128xf32>
    %84 = vector.broadcast %82 : vector<16x1xf32> to vector<16x128xf32>
    %85 = arith.addf %83, %84 : vector<16x128xf32>
    %86 = arith.maximumf %80, %85 : vector<16x128xf32>
    %87 = vector.extract_strided_slice %76 {offsets = [1, 0], sizes = [1, 128], strides = [1, 1]} : vector<8x128xf32> to vector<1x128xf32>
    %88 = vector.extract_strided_slice %79 {offsets = [0, 1], sizes = [16, 1], strides = [1, 1]} : vector<16x8xf32> to vector<16x1xf32>
    %89 = vector.broadcast %87 : vector<1x128xf32> to vector<16x128xf32>
    %90 = vector.broadcast %88 : vector<16x1xf32> to vector<16x128xf32>
    %91 = arith.addf %89, %90 : vector<16x128xf32>
    %92 = arith.maximumf %86, %91 : vector<16x128xf32>
    %93 = vector.extract_strided_slice %76 {offsets = [2, 0], sizes = [1, 128], strides = [1, 1]} : vector<8x128xf32> to vector<1x128xf32>
    %94 = vector.extract_strided_slice %79 {offsets = [0, 2], sizes = [16, 1], strides = [1, 1]} : vector<16x8xf32> to vector<16x1xf32>
    %95 = vector.broadcast %93 : vector<1x128xf32> to vector<16x128xf32>
    %96 = vector.broadcast %94 : vector<16x1xf32> to vector<16x128xf32>
    %97 = arith.addf %95, %96 : vector<16x128xf32>
    %98 = arith.maximumf %92, %97 : vector<16x128xf32>
    %99 = vector.extract_strided_slice %76 {offsets = [3, 0], sizes = [1, 128], strides = [1, 1]} : vector<8x128xf32> to vector<1x128xf32>
    %100 = vector.extract_strided_slice %79 {offsets = [0, 3], sizes = [16, 1], strides = [1, 1]} : vector<16x8xf32> to vector<16x1xf32>
    %101 = vector.broadcast %99 : vector<1x128xf32> to vector<16x128xf32>
    %102 = vector.broadcast %100 : vector<16x1xf32> to vector<16x128xf32>
    %103 = arith.addf %101, %102 : vector<16x128xf32>
    %104 = arith.maximumf %98, %103 : vector<16x128xf32>
    %105 = vector.extract_strided_slice %76 {offsets = [4, 0], sizes = [1, 128], strides = [1, 1]} : vector<8x128xf32> to vector<1x128xf32>
    %106 = vector.extract_strided_slice %79 {offsets = [0, 4], sizes = [16, 1], strides = [1, 1]} : vector<16x8xf32> to vector<16x1xf32>
    %107 = vector.broadcast %105 : vector<1x128xf32> to vector<16x128xf32>
    %108 = vector.broadcast %106 : vector<16x1xf32> to vector<16x128xf32>
    %109 = arith.addf %107, %108 : vector<16x128xf32>
    %110 = arith.maximumf %104, %109 : vector<16x128xf32>
    %111 = vector.extract_strided_slice %76 {offsets = [5, 0], sizes = [1, 128], strides = [1, 1]} : vector<8x128xf32> to vector<1x128xf32>
    %112 = vector.extract_strided_slice %79 {offsets = [0, 5], sizes = [16, 1], strides = [1, 1]} : vector<16x8xf32> to vector<16x1xf32>
    %113 = vector.broadcast %111 : vector<1x128xf32> to vector<16x128xf32>
    %114 = vector.broadcast %112 : vector<16x1xf32> to vector<16x128xf32>
    %115 = arith.addf %113, %114 : vector<16x128xf32>
    %116 = arith.maximumf %110, %115 : vector<16x128xf32>
    %117 = vector.extract_strided_slice %76 {offsets = [6, 0], sizes = [1, 128], strides = [1, 1]} : vector<8x128xf32> to vector<1x128xf32>
    %118 = vector.extract_strided_slice %79 {offsets = [0, 6], sizes = [16, 1], strides = [1, 1]} : vector<16x8xf32> to vector<16x1xf32>
    %119 = vector.broadcast %117 : vector<1x128xf32> to vector<16x128xf32>
    %120 = vector.broadcast %118 : vector<16x1xf32> to vector<16x128xf32>
    %121 = arith.addf %119, %120 : vector<16x128xf32>
    %122 = arith.maximumf %116, %121 : vector<16x128xf32>
    %123 = vector.extract_strided_slice %76 {offsets = [7, 0], sizes = [1, 128], strides = [1, 1]} : vector<8x128xf32> to vector<1x128xf32>
    %124 = vector.extract_strided_slice %79 {offsets = [0, 7], sizes = [16, 1], strides = [1, 1]} : vector<16x8xf32> to vector<16x1xf32>
    %125 = vector.broadcast %123 : vector<1x128xf32> to vector<16x128xf32>
    %126 = vector.broadcast %124 : vector<16x1xf32> to vector<16x128xf32>
    %127 = arith.addf %125, %126 : vector<16x128xf32>
    %128 = arith.maximumf %122, %127 : vector<16x128xf32>
    %c0_23 = arith.constant 0 : index
    %c0_24 = arith.constant 0 : index
    %129 = vector.load %arg6[%c0_23, %c0_24] : memref<16x128xf32, #tpu.memory_space<vmem>>, vector<16x128xf32>
    tpu.vector_store %arg6[%c0_23, %c0_24], %128 {strides = array<i32>} : memref<16x128xf32, #tpu.memory_space<vmem>>, vector<16x128xf32>,
    %c2_i32 = arith.constant 2 : i32
    %c0_i32_25 = arith.constant 0 : i32
    %130 = arith.cmpi eq, %arg1, %c0_i32_25 : i32
    %131 = arith.extui %130 : i1 to i32
    %c0_i32_26 = arith.constant 0 : i32
    %132 = arith.cmpi ne, %131, %c0_i32_26 : i32
    scf.if %132 {
      %c0_27 = arith.constant 0 : index
      %c0_28 = arith.constant 0 : index
      %133 = vector.load %arg6[%c0_27, %c0_28] : memref<16x128xf32, #tpu.memory_space<vmem>>, vector<16x128xf32>
      %cst_29 = arith.constant 0xFF800000 : f32
      %134 = vector.broadcast %cst_29 : f32 to vector<16x128xf32>
      %135 = arith.cmpf ogt, %133, %134 : vector<16x128xf32>
      %cst_30 = arith.constant 0.000000e+00 : f32
      %136 = vector.broadcast %cst_30 : f32 to vector<16x128xf32>
      %137 = arith.select %135, %133, %136 : vector<16x128xi1>, vector<16x128xf32>
      %c0_31 = arith.constant 0 : index
      %c0_32 = arith.constant 0 : index
      %138 = vector.load %arg4[%c0_31, %c0_32] : memref<16x128xf32, #tpu.memory_space<vmem>>, vector<16x128xf32>
      tpu.vector_store %arg4[%c0_31, %c0_32], %137 {strides = array<i32>} : memref<16x128xf32, #tpu.memory_space<vmem>>, vector<16x128xf32>,
      %cst_33 = arith.constant dense<0.000000e+00> : vector<128xf32>
      %139 = vector.multi_reduction <add>, %137, %cst_33 [0] : vector<16x128xf32> to vector<128xf32>
      %140 = vector.shape_cast %139 : vector<128xf32> to vector<1x128xf32>
      %141 = arith.mulf %137, %137 : vector<16x128xf32>
      %cst_34 = arith.constant dense<0.000000e+00> : vector<128xf32>
      %142 = vector.multi_reduction <add>, %141, %cst_34 [0] : vector<16x128xf32> to vector<128xf32>
      %143 = vector.shape_cast %142 : vector<128xf32> to vector<1x128xf32>
      %144 = tpu.iota {dimensions = array<i32: 0>} : vector<8x128xi32>
      %c0_i32_35 = arith.constant 0 : i32
      %145 = vector.broadcast %c0_i32_35 : i32 to vector<8x128xi32>
      %146 = arith.cmpi eq, %144, %145 : vector<8x128xi32>
      %c1_i32_36 = arith.constant 1 : i32
      %147 = vector.broadcast %c1_i32_36 : i32 to vector<8x128xi32>
      %148 = arith.cmpi eq, %144, %147 : vector<8x128xi32>
      %cst_37 = arith.constant 0.000000e+00 : f32
      %149 = vector.shape_cast %143 : vector<1x128xf32> to vector<1x128xf32>
      %150 = vector.broadcast %149 : vector<1x128xf32> to vector<8x128xf32>
      %151 = vector.broadcast %cst_37 : f32 to vector<8x128xf32>
      %152 = arith.select %148, %150, %151 : vector<8x128xi1>, vector<8x128xf32>
      %153 = vector.shape_cast %140 : vector<1x128xf32> to vector<1x128xf32>
      %154 = vector.broadcast %153 : vector<1x128xf32> to vector<8x128xf32>
      %155 = arith.select %146, %154, %152 : vector<8x128xi1>, vector<8x128xf32>
      %c0_38 = arith.constant 0 : index
      %c0_39 = arith.constant 0 : index
      %156 = vector.load %arg5[%c0_38, %c0_39] : memref<8x128xf32, #tpu.memory_space<vmem>>, vector<8x128xf32>
      tpu.vector_store %arg5[%c0_38, %c0_39], %155 {strides = array<i32>} : memref<8x128xf32, #tpu.memory_space<vmem>>, vector<8x128xf32>,
    } else {
    }
    return
  }
  func.func @transform_0(%arg0: i32, %arg1: i32) -> (i32, i32) {
    %c0_i32 = arith.constant 0 : i32
    %c0_i32_0 = arith.constant 0 : i32
    return %arg1, %c0_i32 : i32, i32
  }
  func.func @transform_1(%arg0: i32, %arg1: i32) -> (i32, i32) {
    %c0_i32 = arith.constant 0 : i32
    return %arg0, %arg1 : i32, i32
  }
  func.func @transform_2(%arg0: i32, %arg1: i32) -> (i32, i32) {
    %c0_i32 = arith.constant 0 : i32
    %c0_i32_0 = arith.constant 0 : i32
    return %arg0, %c0_i32 : i32, i32
  }
  func.func @transform_3(%arg0: i32, %arg1: i32) -> (i32, i32) {
    %c0_i32 = arith.constant 0 : i32
    %c0_i32_0 = arith.constant 0 : i32
    return %arg0, %c0_i32 : i32, i32
  }
}

module attributes {stable_mosaic.version = 11 : i64} {
  func.func @_bn_relu_kernel(%arg0: i32, %arg1: memref<16x128xf32, #tpu.memory_space<vmem>>, %arg2: memref<1x128xf32, #tpu.memory_space<vmem>>, %arg3: memref<1x128xf32, #tpu.memory_space<vmem>>, %arg4: memref<16x128xf32, #tpu.memory_space<vmem>>) attributes {dimension_semantics = [#tpu.dimension_semantics<parallel>], iteration_bounds = array<i64: 1>, scalar_prefetch = 0 : i64, scratch_operands = 0 : i64, tpu.core_type = #tpu.core_type<tc>, window_params = [{transform_indices = @transform_0, window_bounds = array<i64: 16, 128>}, {pipeline_mode = #tpu.pipeline_mode<synchronous>, transform_indices = @transform_1, window_bounds = array<i64: 1, 128>}, {pipeline_mode = #tpu.pipeline_mode<synchronous>, transform_indices = @transform_2, window_bounds = array<i64: 1, 128>}, {transform_indices = @transform_3, window_bounds = array<i64: 16, 128>}]} {
    %c0 = arith.constant 0 : index
    %c0_0 = arith.constant 0 : index
    %0 = vector.load %arg1[%c0, %c0_0] : memref<16x128xf32, #tpu.memory_space<vmem>>, vector<16x128xf32>
    %c0_1 = arith.constant 0 : index
    %c0_2 = arith.constant 0 : index
    %1 = vector.load %arg2[%c0_1, %c0_2] : memref<1x128xf32, #tpu.memory_space<vmem>>, vector<1x128xf32>
    %2 = vector.broadcast %1 : vector<1x128xf32> to vector<16x128xf32>
    %3 = arith.mulf %0, %2 : vector<16x128xf32>
    %c0_3 = arith.constant 0 : index
    %c0_4 = arith.constant 0 : index
    %4 = vector.load %arg3[%c0_3, %c0_4] : memref<1x128xf32, #tpu.memory_space<vmem>>, vector<1x128xf32>
    %5 = vector.broadcast %4 : vector<1x128xf32> to vector<16x128xf32>
    %6 = arith.addf %3, %5 : vector<16x128xf32>
    %cst = arith.constant 0.000000e+00 : f32
    %7 = vector.broadcast %cst : f32 to vector<16x128xf32>
    %8 = arith.maximumf %6, %7 : vector<16x128xf32>
    %c0_5 = arith.constant 0 : index
    %c0_6 = arith.constant 0 : index
    %9 = vector.load %arg4[%c0_5, %c0_6] : memref<16x128xf32, #tpu.memory_space<vmem>>, vector<16x128xf32>
    tpu.vector_store %arg4[%c0_5, %c0_6], %8 {strides = array<i32>} : memref<16x128xf32, #tpu.memory_space<vmem>>, vector<16x128xf32>,
    return
  }
  func.func @transform_0(%arg0: i32) -> (i32, i32) {
    %c0_i32 = arith.constant 0 : i32
    %c0_i32_0 = arith.constant 0 : i32
    return %arg0, %c0_i32 : i32, i32
  }
  func.func @transform_1(%arg0: i32) -> (i32, i32) {
    %c0_i32 = arith.constant 0 : i32
    %c0_i32_0 = arith.constant 0 : i32
    %c0_i32_1 = arith.constant 0 : i32
    return %c0_i32, %c0_i32_0 : i32, i32
  }
  func.func @transform_2(%arg0: i32) -> (i32, i32) {
    %c0_i32 = arith.constant 0 : i32
    %c0_i32_0 = arith.constant 0 : i32
    %c0_i32_1 = arith.constant 0 : i32
    return %c0_i32, %c0_i32_0 : i32, i32
  }
  func.func @transform_3(%arg0: i32) -> (i32, i32) {
    %c0_i32 = arith.constant 0 : i32
    %c0_i32_0 = arith.constant 0 : i32
    return %arg0, %c0_i32 : i32, i32
  }
}

</mosaic_0001>

<bundles_post_ra>
// kernel: gcn_bn_forward.3
= control target key start
LH: loop header
LB: loop body
LE: loop exit
PB: predicated region body
PF: predicated region fallthrough
CT: control target
= control target key end

     0   :  { %s82_s0 = inlined_call_operand.vmem [shape: f32[16,128], index: 0, kind: input, shape index: {}]   ;;  %s83_s1 = inlined_call_operand.vmem [shape: f32[1,128], index: 1, kind: input, shape index: {}]   ;;  %s84_s2 = inlined_call_operand.vmem [shape: f32[1,128], index: 2, kind: input, shape index: {}]   ;;  %s85_s3 = inlined_call_operand.vmem [shape: f32[16,128], index: 3, kind: output, shape index: {}]  }
   0x1   :  { %v14_v0 = vld [vmem:[%s82_s0] sm:$0xff]  ;;  %v15_v4 = vld [vmem:[%s82_s0 + $0x8] sm:$0xff] }
   0x2   :  { %v42_v1 = vld [vmem:[%s83_s1] ss:$0 sm:$0xff] }
   0x3   :  { %v43_v2 = vld [vmem:[%s84_s2] ss:$0 sm:$0xff]  ;;  %v23_v3 = vmul.f32 %v42_v1, %v14_v0  ;;  %v24_v5 = vmul.f32 %v42_v1, %v15_v4 }
   0x5   :  { %v32_v6 = vadd.f32 %v43_v2, %v23_v3  ;;  %v33_v7 = vadd.f32 %v43_v2, %v24_v5 }
   0x7   :  { %v34_v8 = vmax.f32 %v32_v6, 0.0  ;;  %v35_v9 = vmax.f32 %v33_v7, 0.0 }
   0x9   :  { %36 = vst [vmem:[%s85_s3] sm:$0xff] %v34_v8  ;;  %37 = vst [vmem:[%s85_s3 + $0x8] sm:$0xff] %v35_v9 }

// kernel: gcn_bn_forward.2
= control target key start
LH: loop header
LB: loop body
LE: loop exit
PB: predicated region body
PF: predicated region fallthrough
CT: control target
= control target key end

     0   :  { %v404_v1 = vmov 0   ;;  %v405_v4 = vmov 2   ;;  %vm29_vm0 = vcmask 64512   ;;  %v406_v7 = vmov -inf   ;;  %s471_s1 = inlined_call_operand.vmem [shape: s8[16,16], index: 1, kind: input, shape index: {}]   ;;  %s472_s0 = inlined_call_operand.vmem [shape: f32[16,128], index: 0, kind: input, shape index: {}]   ;;  %s473_s2 = inlined_call_operand.vmem [shape: f32[16,128], index: 2, kind: output, shape index: {0}]   ;;  %s474_s3 = inlined_call_operand.vmem [shape: f32[8,128], index: 3, kind: output, shape index: {1}]  }
   0x1   :  { %v360_v0 = vld [vmem:[%s471_s1] sm:$0xf]   ;;  %378 = vset.pattern.permute.xlu1 %v404_v1  ;;  %380 = vset.pattern.permute.xlu0 %v405_v4  ;;  %s407_s1 = smov 120   ;;  %v408_v13 = vmov 1   ;;  %v409_v14 = vmov 3   ;;  %v410_v15 = vmov 5   ;;  %v48_v34 = vlaneseq }
   0x2   :  { %v361_v2 = vunpack.c.0.s8 %v360_v0  ;;  %v362_v3 = vunpack.c.1.s8 %v360_v0  ;;  %v411_v16 = vmov 6   ;;  %v412_v17 = vmov 4   ;;  %v43_v41 = vld [vmem:[%s472_s0] sm:$0xff] }
   0x3   :  { %v413_v18 = vmov 7   ;;  %v444_v37 = vshrl.u32 %v48_v34, 7 }
   0x4   :  { %v23_v5 = vcvt.s32.f32 %v361_v2  ;;  %v24_v6 = vcvt.s32.f32 %v362_v3 }
   0x5   :  { %v50_v38 = vsub.s32 0, %v444_v37  ;;  %v68_v39 = vsub.s32 1, %v444_v37  ;;  %v84_v45 = vsub.s32 2, %v444_v37  ;;  %v100_v51 = vsub.s32 3, %v444_v37 }
   0x6   :  { %vm25_vm1 = vcmp.gt.f32.partialorder %v23_v5, 0.0  ;;  %vm26_vm2 = vcmp.gt.f32.partialorder %v24_v6, 0.0  ;;  %v116_v58 = vsub.s32 4, %v444_v37  ;;  %v132_v0 = vsub.s32 5, %v444_v37 }
   0x7   :  { %v27_v8 = vsel %vm25_vm1, 0.0, %v406_v7  ;;  %v28_v9 = vsel %vm26_vm2, 0.0, %v406_v7  ;;  %v51_v43 = vrot.slane %v43_v41, %v50_v38  ;;  %v69_v44 = vrot.slane %v43_v41, %v68_v39 }
   0x8   :  { %31 = vst.msk [vmem:[#allocation3 + $0x8] sm:$0xff] %vm29_vm0, %v28_v9  ;;  %v373_v10 = vpack.i.bf16 %v28_v9, %v27_v8  ;;  %30 = vst.msk [vmem:[#allocation3] sm:$0xff] %vm29_vm0, %v27_v8  ;;  %v85_v50 = vrot.slane %v43_v41, %v84_v45  ;;  %v101_v57 = vrot.slane %v43_v41, %v100_v51  ;;  %v148_v8 = vsub.s32 6, %v444_v37 }
   0x9   :  { %v117_v62 = vrot.slane %v43_v41, %v116_v58  ;;  %v133_v7 = vrot.slane %v43_v41, %v132_v0  ;;  %vm347_vm5 = vcmp.eq.s32.totalorder %v444_v37, 1  ;;  %vm346_vm6 = vcmp.eq.s32.totalorder %v444_v37, 0 }
   0xa   :  { %374 = vrot.lane.b32.xlu0 %v373_v10, %s407_s1 }
   0xf   :  { %v45_v11 = vld [vmem:[#allocation3 + $0x8] sm:$0xff]  ;;  %v44_v12 = vld [vmem:[#allocation3] sm:$0xff] }
  0x10   :  { %59 = vperm.xlu1 %378, %v45_v11   ;;  %87 = vperm.xlu0 %380, %v44_v12  }
  0x14   :  { %379 = vset.pattern.permute.xlu1 %v408_v13  ;;  %383 = vset.pattern.permute.xlu0 %v409_v14 }
  0x15   :  { %71 = vperm.xlu1 %379, %v44_v12   ;;  %107 = vperm.xlu0 %383, %v45_v11  }
  0x19   :  { %75 = vperm.xlu1 %379, %v45_v11   ;;  %385 = vset.pattern.permute.xlu0 %v410_v15 }
  0x1a   :  { %135 = vperm.xlu0 %385, %v44_v12  }
  0x1d   :  { %381 = vset.pattern.permute.xlu1 %v405_v4 }
  0x1e   :  { %91 = vperm.xlu1 %381, %v45_v11   ;;  %388 = vset.pattern.permute.xlu0 %v411_v16 }
  0x1f   :  { %155 = vperm.xlu0 %388, %v45_v11  }
  0x22   :  { %382 = vset.pattern.permute.xlu1 %v409_v14 }
  0x23   :  { %103 = vperm.xlu1 %382, %v44_v12   ;;  %389 = vset.pattern.permute.xlu0 %v404_v1 }
  0x24   :  { %54 = vperm.xlu0 %389, %v44_v12  }
  0x27   :  { %384 = vset.pattern.permute.xlu1 %v412_v17 }
  0x28   :  { %119 = vperm.xlu1 %384, %v44_v12  }
  0x2c   :  { %123 = vperm.xlu1 %384, %v45_v11  }
  0x30   :  { %386 = vset.pattern.permute.xlu1 %v410_v15 }
  0x31   :  { %139 = vperm.xlu1 %386, %v45_v11  }
  0x35   :  { %387 = vset.pattern.permute.xlu1 %v411_v16 }
  0x36   :  { %151 = vperm.xlu1 %387, %v44_v12  }
  0x3a   :  { %390 = vset.pattern.permute.xlu1 %v413_v18 }
  0x3b   :  { %167 = vperm.xlu1 %390, %v44_v12  }
  0x3f   :  { %171 = vperm.xlu1 %390, %v45_v11  }
  0x43   :  { %391 = vset.pattern.permute.xlu1 %v404_v1 }
  0x7c   :  { %v375_v19 = vpop.permute.xlu0 %374 }
  0x7d   :  { %v377_v20 = vunpack.i.h.bf16 %v375_v19  ;;  %v376_v21 = vunpack.i.l.bf16 %v375_v19 }
  0x7f   :  { %42 = vst.msk [vmem:[#allocation3 + $0x18] sm:$0xff] %vm29_vm0, %v377_v20  ;;  %41 = vst.msk [vmem:[#allocation3 + $0x10] sm:$0xff] %vm29_vm0, %v376_v21  ;;  %v180_v20 = vld [vmem:[%s472_s0 + $0x8] sm:$0xff] }
  0x86   :  { %v181_v22 = vld [vmem:[#allocation3 + $0x10] sm:$0xff]  ;;  %v182_v23 = vld [vmem:[#allocation3 + $0x18] sm:$0xff] }
  0x87   :  { %191 = vperm.xlu0 %389, %v181_v22   ;;  %196 = vperm.xlu1 %391, %v182_v23  }
  0x8b   :  { %393 = vset.pattern.permute.xlu0 %v408_v13  ;;  %392 = vset.pattern.permute.xlu1 %v408_v13  ;;  %v60_v24 = vpop.permute.xlu1 %59  ;;  %v88_v30 = vpop.permute.xlu0 %87 }
  0x8c   :  { %212 = vperm.xlu0 %393, %v182_v23   ;;  %208 = vperm.xlu1 %392, %v181_v22   ;;  %v63_v48 = vadd.f32 %v60_v24, %v51_v43  ;;  %v94_v59 = vadd.f32 %v88_v30, %v85_v50 }
  0x90   :  { %395 = vset.pattern.permute.xlu0 %v409_v14  ;;  %394 = vset.pattern.permute.xlu1 %v405_v4  ;;  %v72_v25 = vpop.permute.xlu1 %71  ;;  %v108_v32 = vpop.permute.xlu0 %107 }
  0x91   :  { %240 = vperm.xlu0 %395, %v181_v22   ;;  %224 = vperm.xlu1 %394, %v181_v22   ;;  %v78_v52 = vadd.f32 %v72_v25, %v69_v44  ;;  %v111_v63 = vadd.f32 %v108_v32, %v101_v57 }
  0x94   :  { %v76_v26 = vpop.permute.xlu1 %75 }
  0x95   :  { %398 = vset.pattern.permute.xlu0 %v412_v17  ;;  %228 = vperm.xlu1 %394, %v182_v23   ;;  %v136_v35 = vpop.permute.xlu0 %135  ;;  %v79_v49 = vadd.f32 %v76_v26, %v69_v44  ;;  %v188_v26 = vrot.slane %v180_v20, %v50_v38 }
  0x96   :  { %260 = vperm.xlu0 %398, %v182_v23  }
  0x97   :  { %v81_v55 = vmax.f32 %v63_v48, %v79_v49 }
  0x99   :  { %396 = vset.pattern.permute.xlu1 %v409_v14  ;;  %v92_v27 = vpop.permute.xlu1 %91  ;;  %v149_v14 = vrot.slane %v43_v41, %v148_v8 }
  0x9a   :  { %400 = vset.pattern.permute.xlu0 %v411_v16  ;;  %244 = vperm.xlu1 %396, %v182_v23   ;;  %v156_v40 = vpop.permute.xlu0 %155  ;;  %v95_v56 = vadd.f32 %v92_v27, %v85_v50 }
  0x9b   :  { %288 = vperm.xlu0 %400, %v181_v22  }
  0x9c   :  { %v97_v61 = vmax.f32 %v81_v55, %v95_v56 }
  0x9e   :  { %397 = vset.pattern.permute.xlu1 %v412_v17  ;;  %v104_v28 = vpop.permute.xlu1 %103  ;;  %v113_v5 = vmax.f32 %v97_v61, %v111_v63 }
  0x9f   :  { %403 = vset.pattern.permute.xlu0 %v413_v18  ;;  %256 = vperm.xlu1 %397, %v181_v22   ;;  %v55_v46 = vpop.permute.xlu0 %54  ;;  %v110_v2 = vadd.f32 %v104_v28, %v101_v57 }
  0xa0   :  { %308 = vperm.xlu0 %403, %v182_v23   ;;  %v62_v53 = vadd.f32 %v55_v46, %v51_v43  ;;  %v222_v43 = vrot.slane %v180_v20, %v84_v45  ;;  %v270_v45 = vrot.slane %v180_v20, %v132_v0 }
  0xa2   :  { %v80_v60 = vmax.f32 %v62_v53, %v78_v52 }
  0xa3   :  { %399 = vset.pattern.permute.xlu1 %v410_v15  ;;  %v120_v29 = vpop.permute.xlu1 %119  ;;  %v164_v15 = vsub.s32 7, %v444_v37 }
  0xa4   :  { %272 = vperm.xlu1 %399, %v181_v22   ;;  %v96_v3 = vmax.f32 %v80_v60, %v94_v59  ;;  %v126_v9 = vadd.f32 %v120_v29, %v117_v62 }
  0xa6   :  { %v112_v10 = vmax.f32 %v96_v3, %v110_v2 }
  0xa7   :  { %v124_v31 = vpop.permute.xlu1 %123 }
  0xa8   :  { %276 = vperm.xlu1 %399, %v182_v23   ;;  %v127_v6 = vadd.f32 %v124_v31, %v117_v62  ;;  %v128_v17 = vmax.f32 %v112_v10, %v126_v9  ;;  %v206_v31 = vrot.slane %v180_v20, %v68_v39 }
  0xaa   :  { %v129_v12 = vmax.f32 %v113_v5, %v127_v6  ;;  %v302_v5 = vrot.slane %v180_v20, %v164_v15 }
  0xac   :  { %401 = vset.pattern.permute.xlu1 %v411_v16  ;;  %v140_v33 = vpop.permute.xlu1 %139  ;;  %v142_v16 = vadd.f32 %v136_v35, %v133_v7 }
  0xad   :  { %292 = vperm.xlu1 %401, %v182_v23   ;;  %v143_v13 = vadd.f32 %v140_v33, %v133_v7  ;;  %v165_v23 = vrot.slane %v43_v41, %v164_v15 }
  0xae   :  { %v144_v25 = vmax.f32 %v128_v17, %v142_v16 }
  0xaf   :  { %v145_v21 = vmax.f32 %v129_v12, %v143_v13 }
  0xb1   :  { %402 = vset.pattern.permute.xlu1 %v413_v18  ;;  %v152_v36 = vpop.permute.xlu1 %151 }
  0xb2   :  { %304 = vperm.xlu1 %402, %v181_v22   ;;  %v159_v22 = vadd.f32 %v156_v40, %v149_v14  ;;  %v158_v24 = vadd.f32 %v152_v36, %v149_v14  ;;  %v238_v36 = vrot.slane %v180_v20, %v100_v51 }
  0xb4   :  { %v161_v29 = vmax.f32 %v145_v21, %v159_v22  ;;  %v160_v32 = vmax.f32 %v144_v25, %v158_v24 }
  0xb6   :  { %v168_v42 = vpop.permute.xlu1 %167 }
  0xb7   :  { %v174_v33 = vadd.f32 %v168_v42, %v165_v23  ;;  %v254_v42 = vrot.slane %v180_v20, %v116_v58 }
  0xb9   :  { %v176_v49 = vmax.f32 %v160_v32, %v174_v33 }
  0xba   :  { %v172_v47 = vpop.permute.xlu1 %171 }
  0xbb   :  { %v175_v30 = vadd.f32 %v172_v47, %v165_v23 }
  0xbd   :  { %v177_v46 = vmax.f32 %v161_v29, %v175_v30 }
 0x102   :  { %v197_v54 = vpop.permute.xlu1 %196  ;;  %v192_v4 = vpop.permute.xlu0 %191 }
 0x103   :  { %v200_v34 = vadd.f32 %v197_v54, %v188_v26  ;;  %v199_v35 = vadd.f32 %v192_v4, %v188_v26  ;;  %v286_v4 = vrot.slane %v180_v20, %v148_v8 }
 0x105   :  { %v202_v41 = vmax.f32 %v177_v46, %v200_v34  ;;  %v201_v38 = vmax.f32 %v176_v49, %v199_v35 }
 0x107   :  { %v209_v1 = vpop.permute.xlu1 %208  ;;  %v213_v18 = vpop.permute.xlu0 %212 }
 0x108   :  { %v216_v48 = vadd.f32 %v213_v18, %v206_v31  ;;  %v215_v50 = vadd.f32 %v209_v1, %v206_v31 }
 0x10a   :  { %v218_v55 = vmax.f32 %v202_v41, %v216_v48  ;;  %v217_v39 = vmax.f32 %v201_v38, %v215_v50 }
 0x10c   :  { %v225_v11 = vpop.permute.xlu1 %224  ;;  %v241_v28 = vpop.permute.xlu0 %240 }
 0x10d   :  { %v231_v53 = vadd.f32 %v225_v11, %v222_v43  ;;  %v247_v62 = vadd.f32 %v241_v28, %v238_v36 }
 0x10f   :  { %v233_v54 = vmax.f32 %v217_v39, %v231_v53 }
 0x110   :  { %v229_v19 = vpop.permute.xlu1 %228 }
 0x111   :  { %v261_v40 = vpop.permute.xlu0 %260  ;;  %v232_v52 = vadd.f32 %v229_v19, %v222_v43  ;;  %v249_v3 = vmax.f32 %v233_v54, %v247_v62 }
 0x112   :  { %v264_v1 = vadd.f32 %v261_v40, %v254_v42 }
 0x113   :  { %v234_v57 = vmax.f32 %v218_v55, %v232_v52 }
 0x115   :  { %v245_v27 = vpop.permute.xlu1 %244 }
 0x116   :  { %v248_v56 = vadd.f32 %v245_v27, %v238_v36  ;;  %v289_v59 = vpop.permute.xlu0 %288 }
 0x117   :  { %v295_v0 = vadd.f32 %v289_v59, %v286_v4 }
 0x118   :  { %v250_v60 = vmax.f32 %v234_v57, %v248_v56 }
 0x11a   :  { %v257_v44 = vpop.permute.xlu1 %256  ;;  %v266_v6 = vmax.f32 %v250_v60, %v264_v1 }
 0x11b   :  { %v263_v63 = vadd.f32 %v257_v44, %v254_v42  ;;  %v309_v9 = vpop.permute.xlu0 %308 }
 0x11c   :  { %v312_v13 = vadd.f32 %v309_v9, %v302_v5 }
 0x11d   :  { %v265_v7 = vmax.f32 %v249_v3, %v263_v63 }
 0x11f   :  { %v273_v47 = vpop.permute.xlu1 %272 }
 0x120   :  { %v279_v51 = vadd.f32 %v273_v47, %v270_v45 }
 0x122   :  { %v281_v58 = vmax.f32 %v265_v7, %v279_v51 }
 0x123   :  { %v277_v61 = vpop.permute.xlu1 %276 }
 0x124   :  { %v280_v2 = vadd.f32 %v277_v61, %v270_v45  ;;  %v297_v18 = vmax.f32 %v281_v58, %v295_v0 }
 0x126   :  { %v282_v11 = vmax.f32 %v266_v6, %v280_v2 }
 0x128   :  { %v293_v10 = vpop.permute.xlu1 %292 }
 0x129   :  { %v296_v12 = vadd.f32 %v293_v10, %v286_v4 }
 0x12b   :  { %v298_v14 = vmax.f32 %v282_v11, %v296_v12 }
 0x12d   :  { %v314_v16 = vmax.f32 %v298_v14, %v312_v13  ;;  %v305_v17 = vpop.permute.xlu1 %304 }
 0x12e   :  { %v311_v19 = vadd.f32 %v305_v17, %v302_v5 }
 0x12f   :  { %vm323_vm3 = vcmp.gt.f32.partialorder %v314_v16, -inf }
 0x130   :  { %v325_v21 = vsel %vm323_vm3, %v314_v16, 0.0  ;;  %v313_v22 = vmax.f32 %v297_v18, %v311_v19 }
 0x131   :  { %327 = vst [vmem:[%s473_s2 + $0x8] sm:$0xff] %v325_v21  ;;  %v336_v15 = vmul.f32 %v325_v21, %v325_v21 }
 0x132   :  { %vm322_vm4 = vcmp.gt.f32.partialorder %v313_v22, -inf }
 0x133   :  { %v324_v8 = vsel %vm322_vm4, %v313_v22, 0.0 }
 0x134   :  { %326 = vst [vmem:[%s473_s2] sm:$0xff] %v324_v8  ;;  %v328_v20 = vadd.f32 %v325_v21, %v324_v8  ;;  %v335_v23 = vmul.f32 %v324_v8, %v324_v8 }
 0x136   :  { %v329_v24 = vrot.slane %v328_v20, 4  ;;  %v337_v25 = vadd.f32 %v336_v15, %v335_v23 }
 0x138   :  { %v330_v26 = vadd.f32 %v329_v24, %v328_v20  ;;  %v338_v27 = vrot.slane %v337_v25, 4 }
 0x13a   :  { %v331_v28 = vrot.slane %v330_v26, 2  ;;  %v339_v29 = vadd.f32 %v338_v27, %v337_v25 }
 0x13c   :  { %v332_v30 = vadd.f32 %v331_v28, %v330_v26  ;;  %v340_v31 = vrot.slane %v339_v29, 2 }
 0x13e   :  { %v341_v32 = vadd.f32 %v340_v31, %v339_v29  ;;  %v333_v33 = vrot.slane %v332_v30, 1 }
 0x140   :  { %v342_v34 = vrot.slane %v341_v32, 1  ;;  %v334_v43 = vadd.f32 %v333_v33, %v332_v30 }
 0x142   :  { %v343_v35 = vadd.f32 %v342_v34, %v341_v32 }
 0x144   :  { %v348_v44 = vsel %vm347_vm5, %v343_v35, 0.0 }
 0x145   :  { %v349_v46 = vsel %vm346_vm6, %v334_v43, %v348_v44 }
 0x146   :  { %350 = vst [vmem:[%s474_s3] sm:$0xff] %v349_v46 }

</bundles_post_ra>
